<compile_context>
chip_gen: v5e
topology: v5e:2x2
jax: 0.10.0
libtpu: 0.0.40
codegen_flags: <defaults>
</compile_context>

<pallas_src>
import math
from functools import partial

import jax
import jax.numpy as jnp
from jax.experimental import pallas as pl
from jax.experimental.pallas import tpu as pltpu


def _round_up(v, m):
    return ((v + m - 1) // m) * m


# -----------------------------------------------------------------------------
# Pallas kernel: fused linear -> L2-normalize -> scaled matmul -> +bias
# -----------------------------------------------------------------------------
def _classifier_kernel(x_ref, wl_ref, bl_ref, w_ref, cbias_ref, o_ref, h_ref,
                       *, norm_temperature, norm_weight, use_bias):
    # x_ref:   (TILE_M, D)       compute_dtype
    # wl_ref:  (D, ZD_pad)       compute_dtype  (linear weight, transposed)
    # bl_ref:  (1, ZD_pad)       f32            (linear bias)
    # w_ref:   (ZD_pad, TILE_C)  compute_dtype  (class prompt embeddings)
    # cbias_ref: SMEM (1,) f32   classifier bias scalar
    # o_ref:   (TILE_M, TILE_C)  f32
    # h_ref:   (TILE_M, ZD_pad)  compute_dtype  VMEM scratch (persists over C tiles)

    # h = linear(x) + normalize, computed once per M tile (c == 0 only).
    @pl.when(pl.program_id(1) == 0)
    def _():
        h = jnp.dot(x_ref[...], wl_ref[...], preferred_element_type=jnp.float32)
        h = h + bl_ref[...]                                   # (TILE_M, ZD_pad) f32
        if norm_weight:
            # norm_temperature * h / max(||h||, 1e-12)
            #   == h * (norm_temperature * rsqrt(max(||h||^2, 1e-24)))
            ss = jnp.sum(h * h, axis=-1, keepdims=True)
            inv = jax.lax.rsqrt(jnp.maximum(ss, 1e-24))
            h = h * (norm_temperature * inv)
        h_ref[...] = h.astype(h_ref.dtype)

    out = jnp.dot(h_ref[...], w_ref[...], preferred_element_type=jnp.float32)
    if use_bias:
        out = out + cbias_ref[0]
    o_ref[...] = out.astype(o_ref.dtype)


def decola_classify(x, lin_w_t, lin_b, w, cls_bias, *,
                    norm_temperature=50.0, norm_weight=True, use_bias=True,
                    compute_dtype=jnp.bfloat16, tile_m=128, tile_c=512):
    """x: [B,S,D] f32, lin_w_t: [D,ZD], lin_b: [ZD], w: [ZD,C], cls_bias: [1]."""
    B, S, D = x.shape
    ZD, C = w.shape
    assert lin_w_t.shape == (D, ZD) and lin_b.shape == (ZD,)

    M = B * S
    LANE = 128

    # Tile sizes (keep tiles lane/sublane aligned; don't over-pad tiny demos).
    tm = min(int(tile_m), _round_up(M, 8))
    M_pad = _round_up(M, tm)
    ZD_pad = _round_up(ZD, LANE)
    tc = _round_up(min(int(tile_c), _round_up(C, LANE)), LANE)
    C_pad = _round_up(C, tc)

    # Pad + cast operands (zero padding is exact: padded h columns are zero,
    # padded w rows/cols contribute nothing; padded output = cls_bias, sliced).
    x2 = x.reshape(M, D).astype(compute_dtype)
    if M_pad != M:
        x2 = jnp.pad(x2, ((0, M_pad - M), (0, 0)))
    wl = lin_w_t.astype(compute_dtype)
    if ZD_pad != ZD:
        wl = jnp.pad(wl, ((0, 0), (0, ZD_pad - ZD)))
    bl = lin_b.reshape(1, ZD).astype(jnp.float32)
    if ZD_pad != ZD:
        bl = jnp.pad(bl, ((0, 0), (0, ZD_pad - ZD)))
    wp = w.astype(compute_dtype)
    if ZD_pad != ZD or C_pad != C:
        wp = jnp.pad(wp, ((0, ZD_pad - ZD), (0, C_pad - C)))
    cb = cls_bias.reshape(1).astype(jnp.float32)

    grid = (M_pad // tm, C_pad // tc)

    kernel = partial(_classifier_kernel,
                     norm_temperature=float(norm_temperature),
                     norm_weight=bool(norm_weight),
                     use_bias=bool(use_bias))

    # VMEM budget (double-buffered inputs/outputs + h scratch) with headroom;
    # keeps us inside v7x's smaller VMEM while not shrinking pipelining.
    cd_bytes = jnp.dtype(compute_dtype).itemsize
    est = (2 * (tm * D * cd_bytes            # x tile
                + D * ZD_pad * cd_bytes      # Wl
                + ZD_pad * 4                 # bias row
                + ZD_pad * tc * cd_bytes     # w tile
                + tm * tc * 4)               # out tile
           + tm * ZD_pad * cd_bytes)         # h scratch
    vmem_limit = int(min(128 * 1024 * 1024, max(32 * 1024 * 1024, 2 * est)))

    out = pl.pallas_call(
        kernel,
        out_shape=jax.ShapeDtypeStruct((M_pad, C_pad), jnp.float32),
        grid_spec=pltpu.PrefetchScalarGridSpec(
            num_scalar_prefetch=0,
            grid=grid,
            in_specs=[
                pl.BlockSpec((tm, D), lambda m, c: (m, 0)),        # x (M tile)
                pl.BlockSpec((D, ZD_pad), lambda m, c: (0, 0)),    # linear W^T
                pl.BlockSpec((1, ZD_pad), lambda m, c: (0, 0)),    # linear bias
                pl.BlockSpec((ZD_pad, tc), lambda m, c: (0, c)),   # prompt embeddings
                pl.BlockSpec(memory_space=pltpu.SMEM),             # cls_bias scalar
            ],
            out_specs=pl.BlockSpec((tm, tc), lambda m, c: (m, c)),
            scratch_shapes=[pltpu.VMEM((tm, ZD_pad), compute_dtype)],
        ),
        compiler_params=pltpu.CompilerParams(
            dimension_semantics=("parallel", "arbitrary"),
            vmem_limit_bytes=vmem_limit),
    )(x2, wl, bl, wp, cb)

    return out[:M, :C].reshape(B, S, C)


# -----------------------------------------------------------------------------
# Module wrapper (parameter setup + branch glue in plain JAX)
# -----------------------------------------------------------------------------
class DECOLAZeroshotClassifierPallas:
    def __init__(self, key, num_classes=16, d_model=32, zs_weight_dim=64,
                 norm_weight=True, use_bias=True, norm_temperature=50.0,
                 multi_class_second_stage=False, compute_dtype=jnp.bfloat16):
        self.num_classes = num_classes
        self.d_model = d_model
        self.zs_weight_dim = zs_weight_dim
        self.norm_weight = norm_weight
        self.use_bias = use_bias
        self.norm_temperature = norm_temperature
        self.multi_class_second_stage = multi_class_second_stage
        self.compute_dtype = compute_dtype

        k1, k2, k3 = jax.random.split(key, 3)
        # nn.Linear(d_model, zs_weight_dim): weight (ZD, D), bias (ZD,)
        bound = 1.0 / math.sqrt(d_model)
        lin_w = jax.random.uniform(k1, (zs_weight_dim, d_model),
                                   minval=-bound, maxval=bound, dtype=jnp.float32)
        self.lin_w_t = lin_w.T                      # pre-transpose: (D, ZD)
        self.lin_b = jax.random.uniform(k2, (zs_weight_dim,),
                                        minval=-bound, maxval=bound, dtype=jnp.float32)
        # cls_bias = -log((1-0.01)/0.01)
        self.cls_bias = jnp.full((1,), -math.log((1 - 0.01) / 0.01), dtype=jnp.float32)

        # zs_weight: (num_classes + 1, zs_weight_dim) — rows = class embeddings
        # plus one "a object" embedding, std=0.01, then L2-normalized per row.
        zs_weight = 0.01 * jax.random.normal(
            k3, (num_classes + 1, zs_weight_dim), dtype=jnp.float32)
        if norm_weight:
            zs_weight = zs_weight / jnp.maximum(
                jnp.linalg.norm(zs_weight, axis=1, keepdims=True), 1e-12)
        self.zs_weight = zs_weight

        # TODO(synk): get_fed_loss_inds / load_class_freq (fed-loss class sampling
        # for forward_first_stage_train with use_a_object=False) is an external
        # data-dependent sampler with no clean Pallas equivalent; not ported.

    def _run(self, x, w):
        return decola_classify(x, self.lin_w_t, self.lin_b, w, self.cls_bias,
                               norm_temperature=self.norm_temperature,
                               norm_weight=self.norm_weight,
                               use_bias=self.use_bias,
                               compute_dtype=self.compute_dtype)

    # --- second stage, multi prompt (use_a_object=True) ----------------------
    def forward_second_stage_multi_prompt(self, x):
        w = self.zs_weight[:self.num_classes].T          # (ZD, C)
        out = self._run(x, w)
        return out, out

    # --- second stage, single prompt -----------------------------------------
    def forward_second_stage_single_prompt(self, x, inds, training):
        w = self.zs_weight[:self.num_classes].T          # (ZD, C)
        out = self._run(x, w)
        out_match = jnp.take_along_axis(out, inds[..., None], axis=2)  # gather dim=2
        out_loss = out if self.multi_class_second_stage else out_match
        out_match = out_match if training else out_loss
        return out_loss, out_match

    # --- first stage, test, use_a_object=True ("a object" prompt) ------------
    def forward_first_stage_test_object(self, x):
        B = x.shape[0]
        inds = jnp.arange(self.num_classes, dtype=jnp.int32)
        w = self.zs_weight[self.num_classes:].T          # (ZD, 1)
        out = self._run(x, w)
        inds = jnp.broadcast_to(inds[None], (B, inds.shape[0]))
        w_out = jnp.broadcast_to(w[None], (B,) + w.shape)
        return out, inds, w_out, True

    # pure-JAX reference mirroring the kernel's casting pipeline
    def _ref(self, x, w, compute_dtype=None):
        cd = self.compute_dtype if compute_dtype is None else compute_dtype
        h = jnp.dot(x.astype(cd), self.lin_w_t.astype(cd),
                    preferred_element_type=jnp.float32)
        h = h.astype(jnp.float32) + self.lin_b
        if self.norm_weight:
            ss = jnp.sum(h * h, axis=-1, keepdims=True)
            h = h * (self.norm_temperature * jax.lax.rsqrt(jnp.maximum(ss, 1e-24)))
        out = jnp.dot(h.astype(cd), w.astype(cd),
                      preferred_element_type=jnp.float32).astype(jnp.float32)
        if self.use_bias:
            out = out + self.cls_bias[0]
        return out


if __name__ == "__main__":
    key = jax.random.PRNGKey(0)
    kx, kp, ki = jax.random.split(key, 3)

    B, S, D, ZD, C = 2, 8, 32, 64, 16
    model = DECOLAZeroshotClassifierPallas(kp, num_classes=C, d_model=D,
                                           zs_weight_dim=ZD)

    x = jax.random.normal(kx, (B, S, D), dtype=jnp.float32)
    w_multi = model.zs_weight[:C].T                           # (ZD, C)

    # --- strict f32 check (torch-faithful semantics) -------------------------
    out_f32 = decola_classify(x, model.lin_w_t, model.lin_b, w_multi,
                              model.cls_bias,
                              norm_temperature=model.norm_temperature,
                              norm_weight=True, use_bias=True,
                              compute_dtype=jnp.float32)
    out_f32 = jax.block_until_ready(out_f32)
    ref_f32 = model._ref(x, w_multi, compute_dtype=jnp.float32)
    assert out_f32.shape == (B, S, C)
    assert jnp.allclose(out_f32, ref_f32, atol=5e-3, rtol=5e-3)

    # --- default bf16 path: second stage, multi prompt ------------------------
    out_ms, _ = model.forward_second_stage_multi_prompt(x)
    out_ms = jax.block_until_ready(out_ms)
    ref_ms = model._ref(x, w_multi)
    assert out_ms.shape == (B, S, C)
    assert jnp.allclose(out_ms, ref_ms, atol=3e-2, rtol=3e-2)

    # --- second stage, single prompt (gathered matches) -----------------------
    inds = jax.random.randint(ki, (B, S), 0, C)
    out_loss, out_match = model.forward_second_stage_single_prompt(
        x, inds, training=True)
    out_match = jax.block_until_ready(out_match)
    assert out_match.shape == (B, S, 1)

    # --- first stage test with "a object" prompt ------------------------------
    out_obj, obj_inds, w_obj, _ = model.forward_first_stage_test_object(x)
    out_obj = jax.block_until_ready(out_obj)
    ref_obj = model._ref(x, model.zs_weight[C:].T)
    assert out_obj.shape == (B, S, 1) and obj_inds.shape == (B, C)
    assert jnp.allclose(out_obj, ref_obj, atol=3e-2, rtol=3e-2)

    print("KERNEL_OK")
</pallas_src>

<mosaic_0001>
module attributes {stable_mosaic.version = 11 : i64} {
  func.func @_classifier_kernel(%arg0: i32, %arg1: i32, %arg2: memref<16x32xf32, #tpu.memory_space<vmem>>, %arg3: memref<32x128xf32, #tpu.memory_space<vmem>>, %arg4: memref<1x128xf32, #tpu.memory_space<vmem>>, %arg5: memref<128x128xf32, #tpu.memory_space<vmem>>, %arg6: memref<1xf32, #tpu.memory_space<smem>>, %arg7: memref<16x128xf32, #tpu.memory_space<vmem>>, %arg8: memref<16x128xf32, #tpu.memory_space<vmem>>) attributes {dimension_semantics = [#tpu.dimension_semantics<parallel>, #tpu.dimension_semantics<arbitrary>], iteration_bounds = array<i64: 1, 1>, scalar_prefetch = 0 : i64, scratch_operands = 1 : i64, tpu.core_type = #tpu.core_type<tc>, window_params = [{transform_indices = @transform_0, window_bounds = array<i64: 16, 32>}, {pipeline_mode = #tpu.pipeline_mode<synchronous>, transform_indices = @transform_1, window_bounds = array<i64: 32, 128>}, {pipeline_mode = #tpu.pipeline_mode<synchronous>, transform_indices = @transform_2, window_bounds = array<i64: 1, 128>}, {transform_indices = @transform_3, window_bounds = array<i64: 128, 128>}, {transform_indices = @transform_4, window_bounds = array<i64: 1>}, {transform_indices = @transform_5, window_bounds = array<i64: 16, 128>}]} {
    %c0_i32 = arith.constant 0 : i32
    %0 = arith.cmpi eq, %arg1, %c0_i32 : i32
    %1 = arith.extui %0 : i1 to i32
    %c0_i32_0 = arith.constant 0 : i32
    %2 = arith.cmpi ne, %1, %c0_i32_0 : i32
    scf.if %2 {
      %c0_7 = arith.constant 0 : index
      %c0_8 = arith.constant 0 : index
      %10 = vector.load %arg2[%c0_7, %c0_8] : memref<16x32xf32, #tpu.memory_space<vmem>>, vector<16x32xf32>
      %c0_9 = arith.constant 0 : index
      %c0_10 = arith.constant 0 : index
      %11 = vector.load %arg3[%c0_9, %c0_10] : memref<32x128xf32, #tpu.memory_space<vmem>>, vector<32x128xf32>
      %cst_11 = arith.constant dense<0.000000e+00> : vector<16x128xf32>
      %12 = tpu.matmul %10, %11, %cst_11 {dimension_numbers = #tpu.dot_dimension_numbers<[1], [0], [0], [1], [0, 0, 1, 1], [], []>} : vector<16x32xf32>, vector<32x128xf32>, vector<16x128xf32> -> vector<16x128xf32>
      %c0_12 = arith.constant 0 : index
      %c0_13 = arith.constant 0 : index
      %13 = vector.load %arg4[%c0_12, %c0_13] : memref<1x128xf32, #tpu.memory_space<vmem>>, vector<1x128xf32>
      %14 = vector.broadcast %13 : vector<1x128xf32> to vector<16x128xf32>
      %15 = arith.addf %12, %14 : vector<16x128xf32>
      %16 = arith.mulf %15, %15 : vector<16x128xf32>
      %cst_14 = arith.constant dense<0.000000e+00> : vector<16xf32>
      %17 = vector.multi_reduction <add>, %16, %cst_14 [1] : vector<16x128xf32> to vector<16xf32>
      %18 = vector.shape_cast %17 : vector<16xf32> to vector<16x1xf32>
      %cst_15 = arith.constant 1.000000e-24 : f32
      %19 = vector.broadcast %cst_15 : f32 to vector<16x1xf32>
      %20 = arith.maximumf %18, %19 : vector<16x1xf32>
      %21 = math.rsqrt %20 : vector<16x1xf32>
      %cst_16 = arith.constant 5.000000e+01 : f32
      %22 = vector.broadcast %cst_16 : f32 to vector<16x1xf32>
      %23 = arith.mulf %22, %21 : vector<16x1xf32>
      %24 = vector.broadcast %23 : vector<16x1xf32> to vector<16x128xf32>
      %25 = arith.mulf %15, %24 : vector<16x128xf32>
      %c0_17 = arith.constant 0 : index
      %c0_18 = arith.constant 0 : index
      %26 = vector.load %arg8[%c0_17, %c0_18] : memref<16x128xf32, #tpu.memory_space<vmem>>, vector<16x128xf32>
      tpu.vector_store %arg8[%c0_17, %c0_18], %25 {strides = array<i32>} : memref<16x128xf32, #tpu.memory_space<vmem>>, vector<16x128xf32>,
    } else {
    }
    %c0 = arith.constant 0 : index
    %c0_1 = arith.constant 0 : index
    %3 = vector.load %arg8[%c0, %c0_1] : memref<16x128xf32, #tpu.memory_space<vmem>>, vector<16x128xf32>
    %c0_2 = arith.constant 0 : index
    %c0_3 = arith.constant 0 : index
    %4 = vector.load %arg5[%c0_2, %c0_3] : memref<128x128xf32, #tpu.memory_space<vmem>>, vector<128x128xf32>
    %cst = arith.constant dense<0.000000e+00> : vector<16x128xf32>
    %5 = tpu.matmul %3, %4, %cst {dimension_numbers = #tpu.dot_dimension_numbers<[1], [0], [0], [1], [0, 0, 1, 1], [], []>} : vector<16x128xf32>, vector<128x128xf32>, vector<16x128xf32> -> vector<16x128xf32>
    %c0_4 = arith.constant 0 : index
    %6 = memref.load %arg6[%c0_4] : memref<1xf32, #tpu.memory_space<smem>>
    %7 = vector.broadcast %6 : f32 to vector<16x128xf32>
    %8 = arith.addf %5, %7 : vector<16x128xf32>
    %c0_5 = arith.constant 0 : index
    %c0_6 = arith.constant 0 : index
    %9 = vector.load %arg7[%c0_5, %c0_6] : memref<16x128xf32, #tpu.memory_space<vmem>>, vector<16x128xf32>
    tpu.vector_store %arg7[%c0_5, %c0_6], %8 {strides = array<i32>} : memref<16x128xf32, #tpu.memory_space<vmem>>, vector<16x128xf32>,
    return
  }
  func.func @transform_0(%arg0: i32, %arg1: i32) -> (i32, i32) {
    %c0_i32 = arith.constant 0 : i32
    %c0_i32_0 = arith.constant 0 : i32
    return %arg0, %c0_i32 : i32, i32
  }
  func.func @transform_1(%arg0: i32, %arg1: i32) -> (i32, i32) {
    %c0_i32 = arith.constant 0 : i32
    %c0_i32_0 = arith.constant 0 : i32
    %c0_i32_1 = arith.constant 0 : i32
    return %c0_i32, %c0_i32_0 : i32, i32
  }
  func.func @transform_2(%arg0: i32, %arg1: i32) -> (i32, i32) {
    %c0_i32 = arith.constant 0 : i32
    %c0_i32_0 = arith.constant 0 : i32
    %c0_i32_1 = arith.constant 0 : i32
    return %c0_i32, %c0_i32_0 : i32, i32
  }
  func.func @transform_3(%arg0: i32, %arg1: i32) -> (i32, i32) {
    %c0_i32 = arith.constant 0 : i32
    %c0_i32_0 = arith.constant 0 : i32
    return %c0_i32, %arg1 : i32, i32
  }
  func.func @transform_4(%arg0: i32, %arg1: i32) -> i32 {
    %c0_i32 = arith.constant 0 : i32
    %c0_i32_0 = arith.constant 0 : i32
    return %c0_i32 : i32
  }
  func.func @transform_5(%arg0: i32, %arg1: i32) -> (i32, i32) {
    %c0_i32 = arith.constant 0 : i32
    return %arg0, %arg1 : i32, i32
  }
}

</mosaic_0001>

<bundles_post_ra>
// kernel: tpu_custom_call.1
= control target key start
LH: loop header
LB: loop body
LE: loop exit
PB: predicated region body
PF: predicated region fallthrough
CT: control target
= control target key end

     0   :  { %11 = vsyncpa [#allocation5], 0  ;;  %s419_s0 = inlined_call_operand.hbm [shape: f32[16,32], index: 0, kind: input, shape index: {}]   ;;  %s420_s1 = inlined_call_operand.hbm [shape: f32[32,128], index: 1, kind: input, shape index: {}]   ;;  %s421_s2 = inlined_call_operand.vmem [shape: f32[1,128], index: 2, kind: input, shape index: {}]   ;;  %s422_s3 = inlined_call_operand.hbm [shape: f32[128,128], index: 3, kind: input, shape index: {}]   ;;  %s423_s4 = inlined_call_operand.<no memory space> [shape: f32[1], index: 4, kind: input, shape index: {}]   ;;  %s424_s5 = inlined_call_operand.hbm [shape: f32[16,128], index: 5, kind: output, shape index: {}]  }
   0x1   :  { %12 = vsyncpa [#allocation8], 0 }
   0x2   :  { %13 = vsyncpa [#allocation6], 0  ;;  %s31_s20 = sshll.u32 %s420_s1, 4  ;;  %s343_s21 = smov [#allocation7]   ;;  %s32_s20 = int_to_ptr.hbm [resolvable:$true] %s31_s20 }
   0x3   :  { %s33_s22 = sshll.u32 %s343_s21, 4  ;;  %s18_s25 = sshll.u32 %s419_s0, 4  ;;  %s34_s22 = int_to_ptr.vmem [resolvable:$true] %s33_s22  ;;  %s19_s25 = int_to_ptr.hbm [resolvable:$true] %s18_s25 }
   0x4   :  { %s344_s26 = smov 128   ;;  %s345_s27 = smov 8  }
   0x5   :  { %39 = dma.hbm_to_vmem [thread:$0]  %s32_s20, 512, %s34_s22, [#allocation8], %s344_s26, %s344_s26, %s345_s27  }
   0x6   :  { %s346_s28 = smov [#allocation4]   ;;  %s46_s1 = sshll.u32 %s422_s3, 4  ;;  %s47_s1 = int_to_ptr.hbm [resolvable:$true] %s46_s1 }
   0x7   :  { %s20_s29 = sshll.u32 %s346_s28, 4  ;;  %s347_s0 = smov [#allocation9]   ;;  %s21_s29 = int_to_ptr.vmem [resolvable:$true] %s20_s29 }
   0x8   :  { %26 = dma.hbm_to_vmem [thread:$0]  %s19_s25, 256, %s21_s29, [#allocation5], %s344_s26, %s344_s26, %s345_s27  }
   0x9   :  { %s48_s7 = sshll.u32 %s347_s0, 4  ;;  %s49_s7 = int_to_ptr.vmem [resolvable:$true] %s48_s7 }
   0xa   :  { %54 = dma.hbm_to_vmem [thread:$0]  %s47_s1, 2048, %s49_s7, [#allocation8], %s344_s26, %s344_s26, %s345_s27  }
   0xb   :  { %337 = dma.done.wait [#allocation5], 256  }
   0xc   :  { %338 = vsyncadd [#allocation5], 4294967040 }
   0xd   :  { %339 = dma.done.wait [#allocation8], 2560  }
   0xe   :  { %340 = vsyncadd [#allocation8], 4294964736  ;;  %v78_v0 = vld [vmem:[#allocation7 + $0x18] sm:$0xff]  ;;  %v77_v1 = vld [vmem:[#allocation7 + $0x10] sm:$0xff]  ;;  %vm83_vm0 = vcmask 261120   ;;  %v166_v51 = vstv %s423_s4  ;;  %s348_s10 = smov [#allocation10]  }
   0xf   :  { %102 = vmatpush.msra.mxu0 %v78_v0  ;;  %v76_v2 = vld [vmem:[#allocation7 + $0x8] sm:$0xff]  ;;  %v75_v3 = vld [vmem:[#allocation7] sm:$0xff]  ;;  %v73_v4 = vld [vmem:[#allocation4] sm:$0xff]  ;;  %s196_s11 = sshll.u32 %s348_s10, 4  ;;  %s198_s14 = sshll.u32 %s424_s5, 4  ;;  %s197_s11 = int_to_ptr.vmem [resolvable:$true] %s196_s11  ;;  %s199_s14 = int_to_ptr.hbm [resolvable:$true] %s198_s14 }
  0x10   :  { %v74_v5 = vld [vmem:[#allocation4 + $0x8] sm:$0xff]  ;;  %v163_v7 = vld [vmem:[#allocation9 + $0x70] sm:$0xff]  ;;  %v162_v8 = vld [vmem:[#allocation9 + $0x68] sm:$0xff] }
  0x11   :  { %103 = vmatpush.msra.mxu0 %v77_v1  ;;  %v164_v6 = vld [vmem:[#allocation9 + $0x78] sm:$0xff]  ;;  %v161_v9 = vld [vmem:[#allocation9 + $0x60] sm:$0xff]  ;;  %v236_v11 = vld [vmem:[%s421_s2] ss:$0 sm:$0xff] }
  0x12   :  { %214 = vmatpush.msra.mxu2 %v164_v6  ;;  %167 = vmatpush.msra.mxu1 %v164_v6  ;;  %v160_v17 = vld [vmem:[#allocation9 + $0x58] sm:$0xff]  ;;  %v159_v18 = vld [vmem:[#allocation9 + $0x50] sm:$0xff]  ;;  %v158_v19 = vld [vmem:[#allocation9 + $0x48] sm:$0xff] }
  0x13   :  { %104 = vmatpush.msra.mxu0 %v76_v2  ;;  %v157_v20 = vld [vmem:[#allocation9 + $0x40] sm:$0xff]  ;;  %v156_v21 = vld [vmem:[#allocation9 + $0x38] sm:$0xff]  ;;  %v155_v22 = vld [vmem:[#allocation9 + $0x30] sm:$0xff] }
  0x14   :  { %215 = vmatpush.msra.mxu2 %v163_v7  ;;  %168 = vmatpush.msra.mxu1 %v163_v7  ;;  %v154_v23 = vld [vmem:[#allocation9 + $0x28] sm:$0xff]  ;;  %v153_v24 = vld [vmem:[#allocation9 + $0x20] sm:$0xff]  ;;  %v152_v25 = vld [vmem:[#allocation9 + $0x18] sm:$0xff] }
  0x15   :  { %105 = vmatpush.msra.mxu0 %v75_v3  ;;  %v151_v26 = vld [vmem:[#allocation9 + $0x10] sm:$0xff]  ;;  %v150_v27 = vld [vmem:[#allocation9 + $0x8] sm:$0xff]  ;;  %v149_v28 = vld [vmem:[#allocation9] sm:$0xff] }
  0x16   :  { %212 = vmatmul.msk.f32.vlgmr.msra.gmra.mxu0 %vm83_vm0, %v73_v4  ;;  %216 = vmatpush.msra.mxu2 %v162_v8 }
  0x17   :  { %169 = vmatpush.msra.mxu1 %v162_v8 }
  0x18   :  { %217 = vmatpush.msra.mxu2 %v161_v9 }
  0x19   :  { %170 = vmatpush.msra.mxu1 %v161_v9 }
  0x1a   :  { %218 = vmatpush.msra.mxu2 %v160_v17 }
  0x1b   :  { %171 = vmatpush.msra.mxu1 %v160_v17 }
  0x1c   :  { %219 = vmatpush.msra.mxu2 %v159_v18 }
  0x1d   :  { %172 = vmatpush.msra.mxu1 %v159_v18 }
  0x1e   :  { %213 = vmatmul.msk.f32.gmra.mxu0 %vm83_vm0, %v74_v5  ;;  %220 = vmatpush.msra.mxu2 %v158_v19 }
  0x1f   :  { %173 = vmatpush.msra.mxu1 %v158_v19 }
  0x20   :  { %221 = vmatpush.msra.mxu2 %v157_v20 }
  0x21   :  { %174 = vmatpush.msra.mxu1 %v157_v20 }
  0x22   :  { %222 = vmatpush.msra.mxu2 %v156_v21 }
  0x23   :  { %175 = vmatpush.msra.mxu1 %v156_v21 }
  0x24   :  { %223 = vmatpush.msra.mxu2 %v155_v22 }
  0x25   :  { %176 = vmatpush.msra.mxu1 %v155_v22 }
  0x26   :  { %224 = vmatpush.msra.mxu2 %v154_v23 }
  0x27   :  { %177 = vmatpush.msra.mxu1 %v154_v23 }
  0x28   :  { %225 = vmatpush.msra.mxu2 %v153_v24 }
  0x29   :  { %178 = vmatpush.msra.mxu1 %v153_v24 }
  0x2a   :  { %226 = vmatpush.msra.mxu2 %v152_v25 }
  0x2b   :  { %179 = vmatpush.msra.mxu1 %v152_v25 }
  0x2c   :  { %227 = vmatpush.msra.mxu2 %v151_v26 }
  0x2d   :  { %180 = vmatpush.msra.mxu1 %v151_v26 }
  0x2e   :  { %228 = vmatpush.msra.mxu2 %v150_v27 }
  0x2f   :  { %181 = vmatpush.msra.mxu1 %v150_v27 }
  0x30   :  { %229 = vmatpush.msra.mxu2 %v149_v28 }
  0x31   :  { %182 = vmatpush.msra.mxu1 %v149_v28 }
  0x93   :  { %v107_v10 = vpop.f32.mrf.mxu0 }
  0x94   :  { %v404_v15 = vadd.f32 %v236_v11, %v107_v10 }
  0x96   :  { %v113_v16 = vmul.f32 %v404_v15, %v404_v15 }
  0x9b   :  { %v110_v12 = vpop.f32.mrf.mxu0 }
  0x9c   :  { %v400_v13 = vadd.f32 %v236_v11, %v110_v12 }
  0x9e   :  { %v114_v14 = vmul.f32 %v400_v13, %v400_v13 }
  0xa0   :  { %117 = vadd.xlane.f32.xlu0 %v114_v14 }
  0xa8   :  { %115 = vadd.xlane.f32.xlu0 %v113_v16 }
 0x113   :  { %v118_v29 = vpop.xlane.xlu0 %117 }
 0x114   :  { %v120_v30 = vmax.f32 %v118_v29, 1e-24 }
 0x116   :  { %237 = vrsqrt.f32 %v120_v30  ;;  %vm137_vm2 = vweird.f32 %v120_v30 }
 0x11b   :  { %v116_v31 = vpop.xlane.xlu0 %115 }
 0x11c   :  { %v238_v32 = vpop.eup %237  ;;  %v119_v33 = vmax.f32 %v116_v31, 1e-24 }
 0x11d   :  { %v132_v34 = vmul.f32 %v238_v32, %v120_v30  ;;  %vm138_vm1 = vweird.f32 %v238_v32 }
 0x11e   :  { %239 = vrsqrt.f32 %v119_v33  ;;  %vm139_vm3 = vmor %vm137_vm2, %vm138_vm1  ;;  %vm127_vm5 = vweird.f32 %v119_v33 }
 0x11f   :  { %v133_v35 = vmul.f32 %v238_v32, %v132_v34 }
 0x121   :  { %v134_v36 = vmul.f32 0.5, %v133_v35 }
 0x123   :  { %v135_v37 = vsub.f32 1.5, %v134_v36 }
 0x124   :  { %v240_v38 = vpop.eup %239 }
 0x125   :  { %v122_v39 = vmul.f32 %v240_v38, %v119_v33  ;;  %v136_v40 = vmul.f32 %v238_v32, %v135_v37  ;;  %vm128_vm4 = vweird.f32 %v240_v38 }
 0x126   :  { %vm129_vm6 = vmor %vm127_vm5, %vm128_vm4 }
 0x127   :  { %v123_v41 = vmul.f32 %v240_v38, %v122_v39  ;;  %v140_v42 = vsel %vm139_vm3, %v238_v32, %v136_v40 }
 0x128   :  { %v142_v43 = vmul.f32 50.0, %v140_v42 }
 0x129   :  { %v124_v44 = vmul.f32 0.5, %v123_v41 }
 0x12a   :  { %v144_v45 = vmul.f32 %v142_v43, %v400_v13 }
 0x12b   :  { %v125_v46 = vsub.f32 1.5, %v124_v44 }
 0x12c   :  { %186 = vmatmul.f32.vlgmr.msra.gmra.mxu2 %v144_v45 }
 0x12d   :  { %v126_v47 = vmul.f32 %v240_v38, %v125_v46 }
 0x12f   :  { %v130_v48 = vsel %vm129_vm6, %v240_v38, %v126_v47 }
 0x130   :  { %v141_v49 = vmul.f32 50.0, %v130_v48 }
 0x132   :  { %v143_v50 = vmul.f32 %v141_v49, %v404_v15 }
 0x134   :  { %183 = vmatmul.f32.vlgmr.msra.gmra.mxu1 %v143_v50 }
 0x1af   :  { %v187_v52 = vpop.f32.mrf.mxu2 }
 0x1b0   :  { %v188_v53 = vadd.f32 %v187_v52, %v166_v51 }
 0x1b1   :  { %v184_v54 = vpop.f32.mrf.mxu1 }
 0x1b2   :  { %191 = vst [vmem:[#allocation10 + $0x8] sm:$0xff] %v188_v53  ;;  %v185_v55 = vadd.f32 %v184_v54, %v166_v51 }
 0x1b4   :  { %190 = vst [vmem:[#allocation10] sm:$0xff] %v185_v55 }
 0x1b5   :  { %204 = dma.vmem_to_hbm [thread:$0]  %s197_s11, 256, %s199_s14, [#allocation6], %s344_s26, %s344_s26, %s345_s27  }
 0x1b6   :  { %341 = dma.done.wait [#allocation6], 256  }
 0x1b7   :  { %342 = vsyncadd [#allocation6], 4294967040 }
 0x1b8   :  { %209 = vsyncpa [#allocation5], 1 }
 0x1b9   :  { %210 = vsyncpa [#allocation8], 1 }
 0x1ba   :  { %211 = vsyncpa [#allocation6], 1 }

</bundles_post_ra>
